<compile_context>
chip_gen: v6e
topology: v6e:2x2x1
jax: 0.10.0
libtpu: 0.0.40
codegen_flags: <defaults>
</compile_context>

<pallas_src>
import functools

import jax
import jax.numpy as jnp
from jax import lax
from jax.experimental import pallas as pl
from jax.experimental.pallas import tpu as pltpu


def _double_conv_kernel(x_ref, t1_ref, g1_ref, b1_ref, t2_ref, g2_ref, b2_ref,
                        out_ref, xpad_ref, hpad_ref, lhs1_ref, lhs2_ref, *,
                        N, H, W, Cin, Cmid, Cout, eps, mxu_dtype):
    NH = N * H
    inv_cnt = 1.0 / float(N * H * W)

    def im2row(pad_ref, lhs_ref, wc):
        # Pay the dy-window copies once, explicitly, into a lane-dense bf16
        # im2row scratch (row-aligned stores; lane offsets are multiples of
        # wc), then feed the MXU with ONE merged-K matmul per conv.
        for dy in range(3):
            lhs_ref[:, dy * wc:(dy + 1) * wc] = (
                pad_ref[:, dy:dy + H, :].reshape(NH, wc).astype(mxu_dtype))

    def bn_relu(acc, g_ref, b_ref, c):
        # Train-mode BatchNorm (biased batch variance) + ReLU, entirely off
        # the MXU.  Lane index is w*c + ch; folding the W positions out of the
        # lane dim is a log2(W) butterfly of cyclic lane rolls (direction of
        # the roll is irrelevant for a full cyclic sum), which also leaves the
        # per-channel result replicated across all W lane groups -> no
        # broadcast matmul needed either.
        wc = W * c

        def fold_w(v):                       # (1, wc) f32
            shift = c
            while shift < wc:
                v = v + pltpu.roll(v, shift, 1)
                shift *= 2
            return v

        colsum = jnp.sum(acc, axis=0, keepdims=True)          # (1, wc)
        colsq = jnp.sum(acc * acc, axis=0, keepdims=True)      # (1, wc)
        mean = fold_w(colsum) * inv_cnt                        # per-channel, replicated
        var = fold_w(colsq) * inv_cnt - mean * mean
        # TODO(synk): switch to two-pass / Welford variance when gridding to
        # large N*H*W (one-pass E[x^2]-mean^2 can cancel at scale).
        scale = g_ref[...] * lax.rsqrt(var + eps)              # (1, wc)
        bias = b_ref[...] - mean * scale                       # (1, wc)
        return jnp.maximum(acc * scale + bias, 0.0)

    wc1 = W * Cin
    wc2 = W * Cmid

    # ---- stage x into the H-padded buffer (zero only the two halo rows) ----
    xpad_ref[:, 1:H + 1, :] = x_ref[...].astype(jnp.float32)
    xpad_ref[:, 0:1, :] = jnp.zeros((N, 1, wc1), jnp.float32)
    xpad_ref[:, H + 1:H + 2, :] = jnp.zeros((N, 1, wc1), jnp.float32)

    # ---- conv1: single matmul, K = 3*W*Cin ----
    im2row(xpad_ref, lhs1_ref, wc1)
    acc1 = jnp.dot(lhs1_ref[...], t1_ref[...],
                   preferred_element_type=jnp.float32)          # (NH, W*Cmid)
    h = bn_relu(acc1, g1_ref, b1_ref, Cmid)                     # f32

    # ---- stage h into the H-padded buffer ----
    hpad_ref[:, 1:H + 1, :] = h.reshape(N, H, wc2)
    hpad_ref[:, 0:1, :] = jnp.zeros((N, 1, wc2), jnp.float32)
    hpad_ref[:, H + 1:H + 2, :] = jnp.zeros((N, 1, wc2), jnp.float32)

    # ---- conv2: single matmul, K = 3*W*Cmid ----
    im2row(hpad_ref, lhs2_ref, wc2)
    acc2 = jnp.dot(lhs2_ref[...], t2_ref[...],
                   preferred_element_type=jnp.float32)          # (NH, W*Cout)

    # ---- lane-dense output store: last dim W*Cout (= 128 here) ----
    out_ref[...] = bn_relu(acc2, g2_ref, b2_ref, Cout)


def _toeplitz_conv_weights(w_hwio, W, dtype):
    """Fold the 3 dx taps and the W zero-padding of a 3x3 'SAME' conv into a
    block-Toeplitz matrix per kernel row dy, then merge the 3 dy blocks along
    K so each conv is a single matmul.

    Returns (3*W*Cin, W*Cout) with
      T[dy*W*Cin + w_src*Cin + ci, w_out*Cout + co] = w[dy, dx, ci, co]
    where dx = w_src - w_out + 1, zero when dx not in {0,1,2} (W boundary).
    """
    KH, KW, Ci, Co = w_hwio.shape
    mats = []
    for dy in range(KH):
        m = jnp.zeros((W * Ci, W * Co), jnp.float32)
        for dx in range(KW):
            # shift[w_src, w_out] = 1  iff  w_src == w_out + dx - 1
            shift = jnp.eye(W, k=1 - dx, dtype=jnp.float32)
            m = m + jnp.einsum(
                "ab,ij->aibj", shift, w_hwio[dy, dx].astype(jnp.float32)
            ).reshape(W * Ci, W * Co)
        mats.append(m)
    return jnp.concatenate(mats, axis=0).astype(dtype)


def _pack_channel_vec(v, W):
    """(C,) -> (1, W*C) in the packed lane layout (lane = w*C + c)."""
    return jnp.tile(v.astype(jnp.float32), (W,)).reshape(1, -1)


def double_conv_nhwc(x_nhwc, w1_hwio, g1, b1, w2_hwio, g2, b2, eps=1e-5,
                     mxu_dtype=jnp.bfloat16):
    """Fused DoubleConv on NHWC input; returns NHWC output (f32)."""
    N, H, W, Cin = x_nhwc.shape
    Cmid = w1_hwio.shape[-1]
    Cout = w2_hwio.shape[-1]
    assert W & (W - 1) == 0, "lane-butterfly BN fold assumes power-of-two W"

    t1 = _toeplitz_conv_weights(w1_hwio, W, mxu_dtype)   # (3*W*Cin,  W*Cmid)
    t2 = _toeplitz_conv_weights(w2_hwio, W, mxu_dtype)   # (3*W*Cmid, W*Cout)
    g1p, b1p = _pack_channel_vec(g1, W), _pack_channel_vec(b1, W)
    g2p, b2p = _pack_channel_vec(g2, W), _pack_channel_vec(b2, W)

    # Free, lane-dense repacking (N,H,W,C)->(N,H,W*C); bf16 halves input DMA.
    x_packed = x_nhwc.reshape(N, H, W * Cin).astype(mxu_dtype)

    kernel = functools.partial(_double_conv_kernel, N=N, H=H, W=W, Cin=Cin,
                               Cmid=Cmid, Cout=Cout, eps=eps,
                               mxu_dtype=mxu_dtype)
    vmem = pl.BlockSpec(memory_space=pltpu.MemorySpace.VMEM)

    flops = (2 * N * H * (3 * W * Cin) * (W * Cmid)
             + 2 * N * H * (3 * W * Cmid) * (W * Cout)
             + 10 * N * H * (W * Cmid + W * Cout))
    bytes_accessed = (x_packed.size * x_packed.dtype.itemsize
                      + t1.size * t1.dtype.itemsize
                      + t2.size * t2.dtype.itemsize
                      + (g1p.size + b1p.size + g2p.size + b2p.size) * 4
                      + N * H * W * Cout * 4)

    y_packed = pl.pallas_call(
        kernel,
        out_shape=jax.ShapeDtypeStruct((N * H, W * Cout), jnp.float32),
        in_specs=[vmem] * 7,
        out_specs=vmem,
        scratch_shapes=[
            pltpu.VMEM((N, H + 2, W * Cin), jnp.float32),    # H-padded x
            pltpu.VMEM((N, H + 2, W * Cmid), jnp.float32),   # H-padded h
            pltpu.VMEM((N * H, 3 * W * Cin), mxu_dtype),     # im2row conv1
            pltpu.VMEM((N * H, 3 * W * Cmid), mxu_dtype),    # im2row conv2
        ],
        cost_estimate=pl.CostEstimate(flops=flops,
                                      transcendentals=W * (Cmid + Cout),
                                      bytes_accessed=bytes_accessed),
    )(x_packed, t1, g1p, b1p, t2, g2p, b2p)
    return y_packed.reshape(N, H, W, Cout)


def double_conv_nchw(x_nchw, params, eps=1e-5, mxu_dtype=jnp.bfloat16):
    """PyTorch-convention entry point: x is NCHW, conv weights are OIHW."""
    w1, g1, b1, w2, g2, b2 = params
    x_nhwc = jnp.transpose(x_nchw, (0, 2, 3, 1))
    w1_hwio = jnp.transpose(w1, (2, 3, 1, 0))
    w2_hwio = jnp.transpose(w2, (2, 3, 1, 0))
    y = double_conv_nhwc(x_nhwc, w1_hwio, g1, b1, w2_hwio, g2, b2, eps,
                         mxu_dtype)
    return jnp.transpose(y, (0, 3, 1, 2))


def _reference_nhwc(x, w1_hwio, g1, b1, w2_hwio, g2, b2, eps=1e-5,
                    mxu_dtype=jnp.bfloat16):
    # Same math with XLA convs; operands rounded to the same MXU dtype so the
    # check isolates kernel correctness (f32 accumulation / f32 BN in both).
    def conv(h, w):
        return lax.conv_general_dilated(
            h.astype(mxu_dtype), w.astype(mxu_dtype), (1, 1), "SAME",
            dimension_numbers=("NHWC", "HWIO", "NHWC"),
            preferred_element_type=jnp.float32)

    def bn_relu(h, g, b):
        mean = jnp.mean(h, axis=(0, 1, 2), keepdims=True)
        var = jnp.mean((h - mean) ** 2, axis=(0, 1, 2), keepdims=True)
        return jnp.maximum(
            (h - mean) * lax.rsqrt(var + eps) * g.reshape(1, 1, 1, -1)
            + b.reshape(1, 1, 1, -1), 0.0)

    h = bn_relu(conv(x, w1_hwio), g1, b1)
    return bn_relu(conv(h, w2_hwio), g2, b2)


if __name__ == "__main__":
    # Module config: DoubleConv(in_channels=4, out_channels=8) -> mid=8
    N, Cin, H, W = 2, 4, 16, 16
    Cmid, Cout = 8, 8

    key = jax.random.PRNGKey(0)
    k_x, k_w1, k_w2 = jax.random.split(key, 3)

    x_nchw = jax.random.normal(k_x, (N, Cin, H, W), jnp.float32)
    # Conv weights in PyTorch OIHW layout, deterministic synthetic init.
    w1 = jax.random.normal(k_w1, (Cmid, Cin, 3, 3), jnp.float32) * 0.1
    w2 = jax.random.normal(k_w2, (Cout, Cmid, 3, 3), jnp.float32) * 0.1
    # BatchNorm affine params at PyTorch default init (gamma=1, beta=0).
    g1 = jnp.ones((Cmid,), jnp.float32)
    b1 = jnp.zeros((Cmid,), jnp.float32)
    g2 = jnp.ones((Cout,), jnp.float32)
    b2 = jnp.zeros((Cout,), jnp.float32)

    params = (w1, g1, b1, w2, g2, b2)
    out = jax.block_until_ready(jax.jit(double_conv_nchw)(x_nchw, params))
    assert out.shape == (N, Cout, H, W)

    # Reference check (same NHWC / MXU-dtype math, independent XLA conv path).
    x_nhwc = jnp.transpose(x_nchw, (0, 2, 3, 1))
    ref = _reference_nhwc(x_nhwc, jnp.transpose(w1, (2, 3, 1, 0)), g1, b1,
                          jnp.transpose(w2, (2, 3, 1, 0)), g2, b2)
    ref = jnp.transpose(ref, (0, 3, 1, 2))
    assert jnp.allclose(out, ref, rtol=5e-3, atol=5e-3), "mismatch vs reference"

    print("KERNEL_OK")
</pallas_src>

<mosaic_0001>
module attributes {stable_mosaic.version = 11 : i64} {
  func.func @_double_conv_kernel(%arg0: memref<2x16x64xbf16, #tpu.memory_space<vmem>>, %arg1: memref<192x128xbf16, #tpu.memory_space<vmem>>, %arg2: memref<1x128xf32, #tpu.memory_space<vmem>>, %arg3: memref<1x128xf32, #tpu.memory_space<vmem>>, %arg4: memref<384x128xbf16, #tpu.memory_space<vmem>>, %arg5: memref<1x128xf32, #tpu.memory_space<vmem>>, %arg6: memref<1x128xf32, #tpu.memory_space<vmem>>, %arg7: memref<32x128xf32, #tpu.memory_space<vmem>>, %arg8: memref<2x18x64xf32, #tpu.memory_space<vmem>>, %arg9: memref<2x18x128xf32, #tpu.memory_space<vmem>>, %arg10: memref<32x192xbf16, #tpu.memory_space<vmem>>, %arg11: memref<32x384xbf16, #tpu.memory_space<vmem>>) attributes {dimension_semantics = [], scalar_prefetch = 0 : i64, scratch_operands = 4 : i64, tpu.core_type = #tpu.core_type<tc>} {
    %c0 = arith.constant 0 : index
    %c0_0 = arith.constant 0 : index
    %c0_1 = arith.constant 0 : index
    %0 = vector.load %arg0[%c0, %c0_0, %c0_1] : memref<2x16x64xbf16, #tpu.memory_space<vmem>>, vector<2x16x64xbf16>
    %1 = arith.extf %0 : vector<2x16x64xbf16> to vector<2x16x64xf32>
    %c0_2 = arith.constant 0 : index
    %c1 = arith.constant 1 : index
    %c0_3 = arith.constant 0 : index
    %2 = vector.load %arg8[%c0_2, %c1, %c0_3] : memref<2x18x64xf32, #tpu.memory_space<vmem>>, vector<2x16x64xf32>
    tpu.vector_store %arg8[%c0_2, %c1, %c0_3], %1 {strides = array<i32>} : memref<2x18x64xf32, #tpu.memory_space<vmem>>, vector<2x16x64xf32>,
    %cst = arith.constant 0.000000e+00 : f32
    %3 = vector.broadcast %cst : f32 to vector<2x1x64xf32>
    %c0_4 = arith.constant 0 : index
    %c0_5 = arith.constant 0 : index
    %c0_6 = arith.constant 0 : index
    %4 = vector.load %arg8[%c0_4, %c0_5, %c0_6] : memref<2x18x64xf32, #tpu.memory_space<vmem>>, vector<2x1x64xf32>
    tpu.vector_store %arg8[%c0_4, %c0_5, %c0_6], %3 {strides = array<i32>} : memref<2x18x64xf32, #tpu.memory_space<vmem>>, vector<2x1x64xf32>,
    %cst_7 = arith.constant 0.000000e+00 : f32
    %5 = vector.broadcast %cst_7 : f32 to vector<2x1x64xf32>
    %c0_8 = arith.constant 0 : index
    %c17 = arith.constant 17 : index
    %c0_9 = arith.constant 0 : index
    %6 = vector.load %arg8[%c0_8, %c17, %c0_9] : memref<2x18x64xf32, #tpu.memory_space<vmem>>, vector<2x1x64xf32>
    tpu.vector_store %arg8[%c0_8, %c17, %c0_9], %5 {strides = array<i32>} : memref<2x18x64xf32, #tpu.memory_space<vmem>>, vector<2x1x64xf32>,
    %c0_10 = arith.constant 0 : index
    %c0_11 = arith.constant 0 : index
    %c0_12 = arith.constant 0 : index
    %7 = vector.load %arg8[%c0_10, %c0_11, %c0_12] : memref<2x18x64xf32, #tpu.memory_space<vmem>>, vector<2x16x64xf32>
    %8 = vector.shape_cast %7 : vector<2x16x64xf32> to vector<32x64xf32>
    %9 = arith.truncf %8 : vector<32x64xf32> to vector<32x64xbf16>
    %c0_13 = arith.constant 0 : index
    %c0_14 = arith.constant 0 : index
    %10 = vector.load %arg10[%c0_13, %c0_14] : memref<32x192xbf16, #tpu.memory_space<vmem>>, vector<32x64xbf16>
    tpu.vector_store %arg10[%c0_13, %c0_14], %9 {strides = array<i32>} : memref<32x192xbf16, #tpu.memory_space<vmem>>, vector<32x64xbf16>,
    %c0_15 = arith.constant 0 : index
    %c1_16 = arith.constant 1 : index
    %c0_17 = arith.constant 0 : index
    %11 = vector.load %arg8[%c0_15, %c1_16, %c0_17] : memref<2x18x64xf32, #tpu.memory_space<vmem>>, vector<2x16x64xf32>
    %12 = vector.shape_cast %11 : vector<2x16x64xf32> to vector<32x64xf32>
    %13 = arith.truncf %12 : vector<32x64xf32> to vector<32x64xbf16>
    %c0_18 = arith.constant 0 : index
    %c64 = arith.constant 64 : index
    %14 = vector.load %arg10[%c0_18, %c64] : memref<32x192xbf16, #tpu.memory_space<vmem>>, vector<32x64xbf16>
    tpu.vector_store %arg10[%c0_18, %c64], %13 {strides = array<i32>} : memref<32x192xbf16, #tpu.memory_space<vmem>>, vector<32x64xbf16>,
    %c0_19 = arith.constant 0 : index
    %c2 = arith.constant 2 : index
    %c0_20 = arith.constant 0 : index
    %15 = vector.load %arg8[%c0_19, %c2, %c0_20] : memref<2x18x64xf32, #tpu.memory_space<vmem>>, vector<2x16x64xf32>
    %16 = vector.shape_cast %15 : vector<2x16x64xf32> to vector<32x64xf32>
    %17 = arith.truncf %16 : vector<32x64xf32> to vector<32x64xbf16>
    %c0_21 = arith.constant 0 : index
    %c128 = arith.constant 128 : index
    %18 = vector.load %arg10[%c0_21, %c128] : memref<32x192xbf16, #tpu.memory_space<vmem>>, vector<32x64xbf16>
    tpu.vector_store %arg10[%c0_21, %c128], %17 {strides = array<i32>} : memref<32x192xbf16, #tpu.memory_space<vmem>>, vector<32x64xbf16>,
    %c0_22 = arith.constant 0 : index
    %c0_23 = arith.constant 0 : index
    %19 = vector.load %arg10[%c0_22, %c0_23] : memref<32x192xbf16, #tpu.memory_space<vmem>>, vector<32x192xbf16>
    %c0_24 = arith.constant 0 : index
    %c0_25 = arith.constant 0 : index
    %20 = vector.load %arg1[%c0_24, %c0_25] : memref<192x128xbf16, #tpu.memory_space<vmem>>, vector<192x128xbf16>
    %cst_26 = arith.constant dense<0.000000e+00> : vector<32x128xf32>
    %21 = tpu.matmul %19, %20, %cst_26 {dimension_numbers = #tpu.dot_dimension_numbers<[1], [0], [0], [1], [0, 0, 1, 1], [], []>} : vector<32x192xbf16>, vector<192x128xbf16>, vector<32x128xf32> -> vector<32x128xf32>
    %cst_27 = arith.constant dense<0.000000e+00> : vector<128xf32>
    %22 = vector.multi_reduction <add>, %21, %cst_27 [0] : vector<32x128xf32> to vector<128xf32>
    %23 = vector.shape_cast %22 : vector<128xf32> to vector<1x128xf32>
    %24 = arith.mulf %21, %21 : vector<32x128xf32>
    %cst_28 = arith.constant dense<0.000000e+00> : vector<128xf32>
    %25 = vector.multi_reduction <add>, %24, %cst_28 [0] : vector<32x128xf32> to vector<128xf32>
    %26 = vector.shape_cast %25 : vector<128xf32> to vector<1x128xf32>
    %c8_i32 = arith.constant 8 : i32
    %27 = tpu.dynamic_rotate %23 by %c8_i32 dim 1 : vector<1x128xf32>, i32 -> vector<1x128xf32>
    %28 = arith.addf %23, %27 : vector<1x128xf32>
    %c16_i32 = arith.constant 16 : i32
    %29 = tpu.dynamic_rotate %28 by %c16_i32 dim 1 : vector<1x128xf32>, i32 -> vector<1x128xf32>
    %30 = arith.addf %28, %29 : vector<1x128xf32>
    %c32_i32 = arith.constant 32 : i32
    %31 = tpu.dynamic_rotate %30 by %c32_i32 dim 1 : vector<1x128xf32>, i32 -> vector<1x128xf32>
    %32 = arith.addf %30, %31 : vector<1x128xf32>
    %c64_i32 = arith.constant 64 : i32
    %33 = tpu.dynamic_rotate %32 by %c64_i32 dim 1 : vector<1x128xf32>, i32 -> vector<1x128xf32>
    %34 = arith.addf %32, %33 : vector<1x128xf32>
    %cst_29 = arith.constant 0.001953125 : f32
    %35 = vector.broadcast %cst_29 : f32 to vector<1x128xf32>
    %36 = arith.mulf %34, %35 : vector<1x128xf32>
    %c8_i32_30 = arith.constant 8 : i32
    %37 = tpu.dynamic_rotate %26 by %c8_i32_30 dim 1 : vector<1x128xf32>, i32 -> vector<1x128xf32>
    %38 = arith.addf %26, %37 : vector<1x128xf32>
    %c16_i32_31 = arith.constant 16 : i32
    %39 = tpu.dynamic_rotate %38 by %c16_i32_31 dim 1 : vector<1x128xf32>, i32 -> vector<1x128xf32>
    %40 = arith.addf %38, %39 : vector<1x128xf32>
    %c32_i32_32 = arith.constant 32 : i32
    %41 = tpu.dynamic_rotate %40 by %c32_i32_32 dim 1 : vector<1x128xf32>, i32 -> vector<1x128xf32>
    %42 = arith.addf %40, %41 : vector<1x128xf32>
    %c64_i32_33 = arith.constant 64 : i32
    %43 = tpu.dynamic_rotate %42 by %c64_i32_33 dim 1 : vector<1x128xf32>, i32 -> vector<1x128xf32>
    %44 = arith.addf %42, %43 : vector<1x128xf32>
    %cst_34 = arith.constant 0.001953125 : f32
    %45 = vector.broadcast %cst_34 : f32 to vector<1x128xf32>
    %46 = arith.mulf %44, %45 : vector<1x128xf32>
    %47 = arith.mulf %36, %36 : vector<1x128xf32>
    %48 = arith.subf %46, %47 : vector<1x128xf32>
    %c0_35 = arith.constant 0 : index
    %c0_36 = arith.constant 0 : index
    %49 = vector.load %arg2[%c0_35, %c0_36] : memref<1x128xf32, #tpu.memory_space<vmem>>, vector<1x128xf32>
    %cst_37 = arith.constant 9.99999974E-6 : f32
    %50 = vector.broadcast %cst_37 : f32 to vector<1x128xf32>
    %51 = arith.addf %48, %50 : vector<1x128xf32>
    %52 = math.rsqrt %51 : vector<1x128xf32>
    %53 = arith.mulf %49, %52 : vector<1x128xf32>
    %c0_38 = arith.constant 0 : index
    %c0_39 = arith.constant 0 : index
    %54 = vector.load %arg3[%c0_38, %c0_39] : memref<1x128xf32, #tpu.memory_space<vmem>>, vector<1x128xf32>
    %55 = arith.mulf %36, %53 : vector<1x128xf32>
    %56 = arith.subf %54, %55 : vector<1x128xf32>
    %57 = vector.broadcast %53 : vector<1x128xf32> to vector<32x128xf32>
    %58 = arith.mulf %21, %57 : vector<32x128xf32>
    %59 = vector.broadcast %56 : vector<1x128xf32> to vector<32x128xf32>
    %60 = arith.addf %58, %59 : vector<32x128xf32>
    %cst_40 = arith.constant 0.000000e+00 : f32
    %61 = vector.broadcast %cst_40 : f32 to vector<32x128xf32>
    %62 = arith.maximumf %60, %61 : vector<32x128xf32>
    %63 = vector.shape_cast %62 : vector<32x128xf32> to vector<2x16x128xf32>
    %c0_41 = arith.constant 0 : index
    %c1_42 = arith.constant 1 : index
    %c0_43 = arith.constant 0 : index
    %64 = vector.load %arg9[%c0_41, %c1_42, %c0_43] : memref<2x18x128xf32, #tpu.memory_space<vmem>>, vector<2x16x128xf32>
    tpu.vector_store %arg9[%c0_41, %c1_42, %c0_43], %63 {strides = array<i32>} : memref<2x18x128xf32, #tpu.memory_space<vmem>>, vector<2x16x128xf32>,
    %cst_44 = arith.constant 0.000000e+00 : f32
    %65 = vector.broadcast %cst_44 : f32 to vector<2x1x128xf32>
    %c0_45 = arith.constant 0 : index
    %c0_46 = arith.constant 0 : index
    %c0_47 = arith.constant 0 : index
    %66 = vector.load %arg9[%c0_45, %c0_46, %c0_47] : memref<2x18x128xf32, #tpu.memory_space<vmem>>, vector<2x1x128xf32>
    tpu.vector_store %arg9[%c0_45, %c0_46, %c0_47], %65 {strides = array<i32>} : memref<2x18x128xf32, #tpu.memory_space<vmem>>, vector<2x1x128xf32>,
    %cst_48 = arith.constant 0.000000e+00 : f32
    %67 = vector.broadcast %cst_48 : f32 to vector<2x1x128xf32>
    %c0_49 = arith.constant 0 : index
    %c17_50 = arith.constant 17 : index
    %c0_51 = arith.constant 0 : index
    %68 = vector.load %arg9[%c0_49, %c17_50, %c0_51] : memref<2x18x128xf32, #tpu.memory_space<vmem>>, vector<2x1x128xf32>
    tpu.vector_store %arg9[%c0_49, %c17_50, %c0_51], %67 {strides = array<i32>} : memref<2x18x128xf32, #tpu.memory_space<vmem>>, vector<2x1x128xf32>,
    %c0_52 = arith.constant 0 : index
    %c0_53 = arith.constant 0 : index
    %c0_54 = arith.constant 0 : index
    %69 = vector.load %arg9[%c0_52, %c0_53, %c0_54] : memref<2x18x128xf32, #tpu.memory_space<vmem>>, vector<2x16x128xf32>
    %70 = vector.shape_cast %69 : vector<2x16x128xf32> to vector<32x128xf32>
    %71 = arith.truncf %70 : vector<32x128xf32> to vector<32x128xbf16>
    %c0_55 = arith.constant 0 : index
    %c0_56 = arith.constant 0 : index
    %72 = vector.load %arg11[%c0_55, %c0_56] : memref<32x384xbf16, #tpu.memory_space<vmem>>, vector<32x128xbf16>
    tpu.vector_store %arg11[%c0_55, %c0_56], %71 {strides = array<i32>} : memref<32x384xbf16, #tpu.memory_space<vmem>>, vector<32x128xbf16>,
    %c0_57 = arith.constant 0 : index
    %c1_58 = arith.constant 1 : index
    %c0_59 = arith.constant 0 : index
    %73 = vector.load %arg9[%c0_57, %c1_58, %c0_59] : memref<2x18x128xf32, #tpu.memory_space<vmem>>, vector<2x16x128xf32>
    %74 = vector.shape_cast %73 : vector<2x16x128xf32> to vector<32x128xf32>
    %75 = arith.truncf %74 : vector<32x128xf32> to vector<32x128xbf16>
    %c0_60 = arith.constant 0 : index
    %c128_61 = arith.constant 128 : index
    %76 = vector.load %arg11[%c0_60, %c128_61] : memref<32x384xbf16, #tpu.memory_space<vmem>>, vector<32x128xbf16>
    tpu.vector_store %arg11[%c0_60, %c128_61], %75 {strides = array<i32>} : memref<32x384xbf16, #tpu.memory_space<vmem>>, vector<32x128xbf16>,
    %c0_62 = arith.constant 0 : index
    %c2_63 = arith.constant 2 : index
    %c0_64 = arith.constant 0 : index
    %77 = vector.load %arg9[%c0_62, %c2_63, %c0_64] : memref<2x18x128xf32, #tpu.memory_space<vmem>>, vector<2x16x128xf32>
    %78 = vector.shape_cast %77 : vector<2x16x128xf32> to vector<32x128xf32>
    %79 = arith.truncf %78 : vector<32x128xf32> to vector<32x128xbf16>
    %c0_65 = arith.constant 0 : index
    %c256 = arith.constant 256 : index
    %80 = vector.load %arg11[%c0_65, %c256] : memref<32x384xbf16, #tpu.memory_space<vmem>>, vector<32x128xbf16>
    tpu.vector_store %arg11[%c0_65, %c256], %79 {strides = array<i32>} : memref<32x384xbf16, #tpu.memory_space<vmem>>, vector<32x128xbf16>,
    %c0_66 = arith.constant 0 : index
    %c0_67 = arith.constant 0 : index
    %81 = vector.load %arg11[%c0_66, %c0_67] : memref<32x384xbf16, #tpu.memory_space<vmem>>, vector<32x384xbf16>
    %c0_68 = arith.constant 0 : index
    %c0_69 = arith.constant 0 : index
    %82 = vector.load %arg4[%c0_68, %c0_69] : memref<384x128xbf16, #tpu.memory_space<vmem>>, vector<384x128xbf16>
    %cst_70 = arith.constant dense<0.000000e+00> : vector<32x128xf32>
    %83 = tpu.matmul %81, %82, %cst_70 {dimension_numbers = #tpu.dot_dimension_numbers<[1], [0], [0], [1], [0, 0, 1, 1], [], []>} : vector<32x384xbf16>, vector<384x128xbf16>, vector<32x128xf32> -> vector<32x128xf32>
    %cst_71 = arith.constant dense<0.000000e+00> : vector<128xf32>
    %84 = vector.multi_reduction <add>, %83, %cst_71 [0] : vector<32x128xf32> to vector<128xf32>
    %85 = vector.shape_cast %84 : vector<128xf32> to vector<1x128xf32>
    %86 = arith.mulf %83, %83 : vector<32x128xf32>
    %cst_72 = arith.constant dense<0.000000e+00> : vector<128xf32>
    %87 = vector.multi_reduction <add>, %86, %cst_72 [0] : vector<32x128xf32> to vector<128xf32>
    %88 = vector.shape_cast %87 : vector<128xf32> to vector<1x128xf32>
    %c8_i32_73 = arith.constant 8 : i32
    %89 = tpu.dynamic_rotate %85 by %c8_i32_73 dim 1 : vector<1x128xf32>, i32 -> vector<1x128xf32>
    %90 = arith.addf %85, %89 : vector<1x128xf32>
    %c16_i32_74 = arith.constant 16 : i32
    %91 = tpu.dynamic_rotate %90 by %c16_i32_74 dim 1 : vector<1x128xf32>, i32 -> vector<1x128xf32>
    %92 = arith.addf %90, %91 : vector<1x128xf32>
    %c32_i32_75 = arith.constant 32 : i32
    %93 = tpu.dynamic_rotate %92 by %c32_i32_75 dim 1 : vector<1x128xf32>, i32 -> vector<1x128xf32>
    %94 = arith.addf %92, %93 : vector<1x128xf32>
    %c64_i32_76 = arith.constant 64 : i32
    %95 = tpu.dynamic_rotate %94 by %c64_i32_76 dim 1 : vector<1x128xf32>, i32 -> vector<1x128xf32>
    %96 = arith.addf %94, %95 : vector<1x128xf32>
    %cst_77 = arith.constant 0.001953125 : f32
    %97 = vector.broadcast %cst_77 : f32 to vector<1x128xf32>
    %98 = arith.mulf %96, %97 : vector<1x128xf32>
    %c8_i32_78 = arith.constant 8 : i32
    %99 = tpu.dynamic_rotate %88 by %c8_i32_78 dim 1 : vector<1x128xf32>, i32 -> vector<1x128xf32>
    %100 = arith.addf %88, %99 : vector<1x128xf32>
    %c16_i32_79 = arith.constant 16 : i32
    %101 = tpu.dynamic_rotate %100 by %c16_i32_79 dim 1 : vector<1x128xf32>, i32 -> vector<1x128xf32>
    %102 = arith.addf %100, %101 : vector<1x128xf32>
    %c32_i32_80 = arith.constant 32 : i32
    %103 = tpu.dynamic_rotate %102 by %c32_i32_80 dim 1 : vector<1x128xf32>, i32 -> vector<1x128xf32>
    %104 = arith.addf %102, %103 : vector<1x128xf32>
    %c64_i32_81 = arith.constant 64 : i32
    %105 = tpu.dynamic_rotate %104 by %c64_i32_81 dim 1 : vector<1x128xf32>, i32 -> vector<1x128xf32>
    %106 = arith.addf %104, %105 : vector<1x128xf32>
    %cst_82 = arith.constant 0.001953125 : f32
    %107 = vector.broadcast %cst_82 : f32 to vector<1x128xf32>
    %108 = arith.mulf %106, %107 : vector<1x128xf32>
    %109 = arith.mulf %98, %98 : vector<1x128xf32>
    %110 = arith.subf %108, %109 : vector<1x128xf32>
    %c0_83 = arith.constant 0 : index
    %c0_84 = arith.constant 0 : index
    %111 = vector.load %arg5[%c0_83, %c0_84] : memref<1x128xf32, #tpu.memory_space<vmem>>, vector<1x128xf32>
    %cst_85 = arith.constant 9.99999974E-6 : f32
    %112 = vector.broadcast %cst_85 : f32 to vector<1x128xf32>
    %113 = arith.addf %110, %112 : vector<1x128xf32>
    %114 = math.rsqrt %113 : vector<1x128xf32>
    %115 = arith.mulf %111, %114 : vector<1x128xf32>
    %c0_86 = arith.constant 0 : index
    %c0_87 = arith.constant 0 : index
    %116 = vector.load %arg6[%c0_86, %c0_87] : memref<1x128xf32, #tpu.memory_space<vmem>>, vector<1x128xf32>
    %117 = arith.mulf %98, %115 : vector<1x128xf32>
    %118 = arith.subf %116, %117 : vector<1x128xf32>
    %119 = vector.broadcast %115 : vector<1x128xf32> to vector<32x128xf32>
    %120 = arith.mulf %83, %119 : vector<32x128xf32>
    %121 = vector.broadcast %118 : vector<1x128xf32> to vector<32x128xf32>
    %122 = arith.addf %120, %121 : vector<32x128xf32>
    %cst_88 = arith.constant 0.000000e+00 : f32
    %123 = vector.broadcast %cst_88 : f32 to vector<32x128xf32>
    %124 = arith.maximumf %122, %123 : vector<32x128xf32>
    %c0_89 = arith.constant 0 : index
    %c0_90 = arith.constant 0 : index
    %125 = vector.load %arg7[%c0_89, %c0_90] : memref<32x128xf32, #tpu.memory_space<vmem>>, vector<32x128xf32>
    tpu.vector_store %arg7[%c0_89, %c0_90], %124 {strides = array<i32>} : memref<32x128xf32, #tpu.memory_space<vmem>>, vector<32x128xf32>,
    return
  }
}

</mosaic_0001>

<bundles_post_ra>
// kernel: tile.23
= control target key start
LH: loop header
LB: loop body
LE: loop exit
PB: predicated region body
PF: predicated region fallthrough
CT: control target
= control target key end

     0   :  { %s28_s0 = inlined_call_operand.vmem [shape: f32[8], index: 0, kind: input, shape index: {}]   ;;  %s29_s1 = inlined_call_operand.vmem [shape: f32[16,8], index: 1, kind: output, shape index: {}]  }
   0x1   :  { %v4_v0 = vld [vmem:[%s28_s0] ss:$0 sm:$0xff] }
   0x2   :  { %5 = vst [vmem:[%s29_s1] sm:$0xff] %v4_v0  ;;  %8 = vst [vmem:[%s29_s1 + $0x8] sm:$0xff] %v4_v0 }

// kernel: tile.24
= control target key start
LH: loop header
LB: loop body
LE: loop exit
PB: predicated region body
PF: predicated region fallthrough
CT: control target
= control target key end

     0   :  { %s133_s10 = smov 120   ;;  %s134_s11 = smov 104   ;;  %vm3_vm0 = vcmask 64512   ;;  %vm9_vm1 = vcmask 1048512   ;;  %vm15_vm2 = vcmask 982912   ;;  %vm21_vm3 = vcmask 917312   ;;  %s209_s0 = inlined_call_operand.vmem [shape: f32[16,8], index: 0, kind: input, shape index: {}]   ;;  %s210_s1 = inlined_call_operand.vmem [shape: f32[1,128], index: 1, kind: output, shape index: {}]  }
   0x1   :  { %v103_v0 = vld [vmem:[%s209_s0 + $0xf] sm:$0x1]   ;;  %v105_v1 = vld [vmem:[%s209_s0 + $0xd] sm:$0x1]   ;;  %v104_v2 = vld [vmem:[%s209_s0 + $0xe] sm:$0x1]  }
   0x2   :  { %7 = vrot.lane.b32.xlu0 %v103_v0, %s133_s10  ;;  %19 = vrot.lane.b32.xlu1 %v105_v1, %s134_s11  ;;  %v106_v3 = vld [vmem:[%s209_s0 + $0xc] sm:$0x1]   ;;  %s135_s16 = smov 112   ;;  %s136_s17 = smov 96   ;;  %v107_v4 = vld [vmem:[%s209_s0 + $0xb] sm:$0x1]  }
   0x3   :  { %v108_v5 = vld [vmem:[%s209_s0 + $0xa] sm:$0x1]   ;;  %v2_v6 = vld [vmem:[%s209_s0] sm:$0x1]   ;;  %s137_s24 = smov 88   ;;  %s138_s25 = smov 80  }
   0x4   :  { %4 = vst.msk [vmem:[#allocation0] sm:$0x1] %vm3_vm0, %v2_v6   ;;  %v109_v7 = vld [vmem:[%s209_s0 + $0x9] sm:$0x1]   ;;  %v110_v8 = vld [vmem:[%s209_s0 + $0x8] sm:$0x1]  }
   0x5   :  { %s139_s30 = smov 72   ;;  %s140_s2 = smov 64   ;;  %v111_v9 = vld [vmem:[%s209_s0 + $0x7] sm:$0x1]   ;;  %v112_v10 = vld [vmem:[%s209_s0 + $0x6] sm:$0x1]  }
   0x6   :  { %13 = vrot.lane.b32.xlu0 %v104_v2, %s135_s16  ;;  %25 = vrot.lane.b32.xlu1 %v106_v3, %s136_s17  ;;  %s141_s7 = smov 56   ;;  %s142_s8 = smov 48   ;;  %v113_v11 = vld [vmem:[%s209_s0 + $0x5] sm:$0x1]   ;;  %v114_v12 = vld [vmem:[%s209_s0 + $0x4] sm:$0x1]  }
   0x7   :  { %s143_s13 = smov 40   ;;  %s144_s14 = smov 32   ;;  %v115_v13 = vld [vmem:[%s209_s0 + $0x3] sm:$0x1]   ;;  %v116_v14 = vld [vmem:[%s209_s0 + $0x2] sm:$0x1]  }
   0x8   :  { %s145_s19 = smov 24   ;;  %s146_s20 = smov 16   ;;  %v117_v15 = vld [vmem:[%s209_s0 + $0x1] sm:$0x1]   ;;  %vm27_vm4 = vcmask 851712   ;;  %vm33_vm5 = vcmask 786112  }
   0x9   :  { %s147_s0 = smov 8   ;;  %vm39_vm6 = vcmask 720512   ;;  %vm45_vm7 = vcmask 654912   ;;  %vm51_vm8 = vcmask 589312   ;;  %vm57_vm9 = vcmask 523712  }
   0xa   :  { %31 = vrot.lane.b32.xlu0 %v107_v4, %s137_s24  ;;  %37 = vrot.lane.b32.xlu1 %v108_v5, %s138_s25  ;;  %vm63_vm10 = vcmask 458112   ;;  %vm69_vm11 = vcmask 392512   ;;  %vm75_vm12 = vcmask 326912   ;;  %vm81_vm13 = vcmask 261312  }
   0xb   :  { %vm87_vm14 = vcmask 195712   ;;  %vm93_vm15 = vcmask 130112  }
   0xe   :  { %43 = vrot.lane.b32.xlu0 %v109_v7, %s139_s30  ;;  %49 = vrot.lane.b32.xlu1 %v110_v8, %s140_s2 }
  0x12   :  { %55 = vrot.lane.b32.xlu0 %v111_v9, %s141_s7  ;;  %61 = vrot.lane.b32.xlu1 %v112_v10, %s142_s8 }
  0x16   :  { %67 = vrot.lane.b32.xlu0 %v113_v11, %s143_s13  ;;  %73 = vrot.lane.b32.xlu1 %v114_v12, %s144_s14 }
  0x1a   :  { %79 = vrot.lane.b32.xlu0 %v115_v13, %s145_s19  ;;  %85 = vrot.lane.b32.xlu1 %v116_v14, %s146_s20 }
  0x1e   :  { %91 = vrot.lane.b32.xlu0 %v117_v15, %s147_s0 }
  0x74   :  { %v8_v16 = vpop.permute.xlu0 %7   ;;  %v20_v17 = vpop.permute.xlu1 %19  }
  0x75   :  { %10 = vst.msk [vmem:[#allocation0] sm:$0x1] %vm9_vm1, %v8_v16  }
  0x78   :  { %v14_v18 = vpop.permute.xlu0 %13   ;;  %v26_v19 = vpop.permute.xlu1 %25  }
  0x79   :  { %16 = vst.msk [vmem:[#allocation0] sm:$0x1] %vm15_vm2, %v14_v18  }
  0x7a   :  { %22 = vst.msk [vmem:[#allocation0] sm:$0x1] %vm21_vm3, %v20_v17  }
  0x7b   :  { %28 = vst.msk [vmem:[#allocation0] sm:$0x1] %vm27_vm4, %v26_v19  }
  0x7c   :  { %v32_v20 = vpop.permute.xlu0 %31   ;;  %v38_v21 = vpop.permute.xlu1 %37  }
  0x7d   :  { %34 = vst.msk [vmem:[#allocation0] sm:$0x1] %vm33_vm5, %v32_v20  }
  0x7e   :  { %40 = vst.msk [vmem:[#allocation0] sm:$0x1] %vm39_vm6, %v38_v21  }
  0x80   :  { %v44_v22 = vpop.permute.xlu0 %43   ;;  %v50_v23 = vpop.permute.xlu1 %49  }
  0x81   :  { %46 = vst.msk [vmem:[#allocation0] sm:$0x1] %vm45_vm7, %v44_v22  }
  0x82   :  { %52 = vst.msk [vmem:[#allocation0] sm:$0x1] %vm51_vm8, %v50_v23  }
  0x84   :  { %v56_v24 = vpop.permute.xlu0 %55   ;;  %v62_v25 = vpop.permute.xlu1 %61  }
  0x85   :  { %58 = vst.msk [vmem:[#allocation0] sm:$0x1] %vm57_vm9, %v56_v24  }
  0x86   :  { %64 = vst.msk [vmem:[#allocation0] sm:$0x1] %vm63_vm10, %v62_v25  }
  0x88   :  { %v68_v26 = vpop.permute.xlu0 %67   ;;  %v74_v27 = vpop.permute.xlu1 %73  }
  0x89   :  { %70 = vst.msk [vmem:[#allocation0] sm:$0x1] %vm69_vm11, %v68_v26  }
  0x8a   :  { %76 = vst.msk [vmem:[#allocation0] sm:$0x1] %vm75_vm12, %v74_v27  }
  0x8c   :  { %v80_v28 = vpop.permute.xlu0 %79   ;;  %v86_v29 = vpop.permute.xlu1 %85  }
  0x8d   :  { %82 = vst.msk [vmem:[#allocation0] sm:$0x1] %vm81_vm13, %v80_v28  }
  0x8e   :  { %88 = vst.msk [vmem:[#allocation0] sm:$0x1] %vm87_vm14, %v86_v29  }
  0x90   :  { %v92_v30 = vpop.permute.xlu0 %91  }
  0x91   :  { %94 = vst.msk [vmem:[#allocation0] sm:$0x1] %vm93_vm15, %v92_v30  }
  0x98   :  { %v99_v31 = vld [vmem:[#allocation0] sm:$0x1] }
  0x99   :  { %102 = vst [vmem:[%s210_s1] sm:$0x1] %v99_v31 }

// kernel: double_conv_nchw.1
= control target key start
LH: loop header
LB: loop body
LE: loop exit
PB: predicated region body
PF: predicated region fallthrough
CT: control target
= control target key end

     0   :  { %vm40_vm0 = vcmask 516096   ;;  %vm35_vm1 = vcmask 523264   ;;  %v1103_v2 = vmov 0   ;;  %v1104_v3 = vmov 0.0   ;;  %s1105_s12 = smov 64   ;;  %s1107_s29 = smov 16   ;;  %s1391_s0 = inlined_call_operand.vmem [shape: bf16[2,16,64], index: 0, kind: input, shape index: {}]   ;;  %s1392_s1 = inlined_call_operand.vmem [shape: bf16[192,128], index: 1, kind: input, shape index: {}]   ;;  %s1393_s4 = inlined_call_operand.vmem [shape: bf16[384,128], index: 4, kind: input, shape index: {}]   ;;  %s1394_s2 = inlined_call_operand.vmem [shape: f32[1,128], index: 2, kind: input, shape index: {}]   ;;  %s1395_s3 = inlined_call_operand.vmem [shape: f32[1,128], index: 3, kind: input, shape index: {}]   ;;  %s1396_s5 = inlined_call_operand.vmem [shape: f32[1,128], index: 5, kind: input, shape index: {}]   ;;  %s1397_s6 = inlined_call_operand.vmem [shape: f32[1,128], index: 6, kind: input, shape index: {}]   ;;  %s1398_s7 = inlined_call_operand.vmem [shape: f32[32,128], index: 7, kind: output, shape index: {}]  }
   0x1   :  { %v977_v0 = vld [vmem:[%s1391_s0] sm:$0xff]   ;;  %v984_v1 = vld [vmem:[%s1391_s0 + $0x8] sm:$0xff]   ;;  %251 = vmatprep.subr.bf16.mxu0 %v1103_v2  ;;  %41 = vst.msk [vmem:[#allocation2] sm:$0x1] %vm40_vm0, %v1104_v3  ;;  %43 = vst.msk [vmem:[#allocation2 + $0x11] sm:$0x1] %vm40_vm0, %v1104_v3 }
   0x2   :  { %44 = vst.msk [vmem:[#allocation2 + $0x29] sm:$0x1] %vm40_vm0, %v1104_v3  ;;  %388 = vst [vmem:[#allocation3 + $0x29] sm:$0x1] %v1104_v3  ;;  %v978_v4 = vunpack.c.l.bf16 %v977_v0  ;;  %v979_v5 = vunpack.c.h.bf16 %v977_v0  ;;  %v982_v6 = vunpack.c.l.bf16 %v984_v1  ;;  %v983_v7 = vunpack.c.h.bf16 %v984_v1  ;;  %v1049_v8 = vld [vmem:[%s1392_s1 + $0x38] sm:$0xff]   ;;  %v1050_v9 = vld [vmem:[%s1392_s1 + $0x30] sm:$0xff]  }
   0x3   :  { %42 = vst.msk [vmem:[#allocation2 + $0x18] sm:$0x1] %vm40_vm0, %v1104_v3  ;;  %385 = vst [vmem:[#allocation3] sm:$0x1] %v1104_v3  ;;  %252 = vmatpush1.bf16.msra.mxu0 %v1049_v8  ;;  %v1051_v10 = vld [vmem:[%s1392_s1 + $0x28] sm:$0xff]   ;;  %v1052_v11 = vld [vmem:[%s1392_s1 + $0x20] sm:$0xff]  }
   0x4   :  { %386 = vst [vmem:[#allocation3 + $0x18] sm:$0x1] %v1104_v3  ;;  %387 = vst [vmem:[#allocation3 + $0x11] sm:$0x1] %v1104_v3  ;;  %253 = vmatprep.subr.bf16.mxu0 %v1103_v2  ;;  %vm65_vm2 = vcmask 519168   ;;  %v1053_v32 = vld [vmem:[%s1392_s1 + $0x18] sm:$0xff]  }
   0x5   :  { %36 = vst.msk [vmem:[#allocation2 + $0x1] sm:$0xff] %vm35_vm1, %v978_v4  ;;  %37 = vst.msk [vmem:[#allocation2 + $0x9] sm:$0xff] %vm35_vm1, %v979_v5  ;;  %v1054_v37 = vld [vmem:[%s1392_s1 + $0x10] sm:$0xff]   ;;  %v1055_v38 = vld [vmem:[%s1392_s1 + $0x8] sm:$0xff]   ;;  %vm98_vm3 = vcmask 1043968   ;;  %s1108_s0 = smov 32  }
   0x6   :  { %38 = vst.msk [vmem:[#allocation2 + $0x19] sm:$0xff] %vm35_vm1, %v982_v6  ;;  %39 = vst.msk [vmem:[#allocation2 + $0x21] sm:$0xff] %vm35_vm1, %v983_v7  ;;  %v1056_v39 = vld [vmem:[%s1392_s1] sm:$0xff]   ;;  %v1057_v40 = vld [vmem:[%s1392_s1 + $0x58] sm:$0xff]  }
   0x7   :  { %254 = vmatpush1.bf16.msra.mxu0 %v1050_v9  ;;  %v1058_v41 = vld [vmem:[%s1392_s1 + $0x50] sm:$0xff]   ;;  %v1059_v42 = vld [vmem:[%s1392_s1 + $0x48] sm:$0xff]   ;;  %v1060_v43 = vld [vmem:[%s1392_s1 + $0x40] sm:$0xff]   ;;  %s1106_s1 = smov 8  }
   0x8   :  { %255 = vmatprep.subr.bf16.mxu0 %v1103_v2 }
   0xb   :  { %256 = vmatpush1.bf16.msra.mxu0 %v1051_v10 }
   0xc   :  { %v70_v12 = vld [vmem:[#allocation2 + $0x1] sm:$0xff]  ;;  %v71_v14 = vld [vmem:[#allocation2 + $0x9] sm:$0xff]  ;;  %257 = vmatprep.subr.bf16.mxu0 %v1103_v2 }
   0xd   :  { %v72_v13 = vld [vmem:[#allocation2 + $0x19] sm:$0xff]  ;;  %v956_v15 = vpack.c.bf16 %v70_v12, %v70_v12  ;;  %v73_v17 = vld [vmem:[#allocation2 + $0x21] sm:$0xff]  ;;  %v957_v20 = vpack.c.bf16 %v71_v14, %v71_v14  ;;  %v104_v34 = vld [vmem:[#allocation2 + $0xa] sm:$0xff] }
   0xe   :  { %v958_v16 = vpack.c.bf16 %v72_v13, %v72_v13  ;;  %v105_v18 = vld [vmem:[#allocation2 + $0x1a] sm:$0xff]  ;;  %v106_v19 = vld [vmem:[#allocation2 + $0x22] sm:$0xff]  ;;  %v959_v21 = vpack.c.bf16 %v73_v17, %v73_v17  ;;  %v961_v36 = vpack.c.bf16 %v104_v34, %v104_v34 }
   0xf   :  { %v962_v22 = vpack.c.bf16 %v105_v18, %v105_v18  ;;  %v963_v23 = vpack.c.bf16 %v106_v19, %v106_v19  ;;  %v45_v24 = vld [vmem:[#allocation2] sm:$0xff]  ;;  %v47_v25 = vld [vmem:[#allocation2 + $0x18] sm:$0xff]  ;;  %v46_v26 = vld [vmem:[#allocation2 + $0x8] sm:$0xff]  ;;  %86 = vrot.lane.b32.xlu0 %v956_v15, %s1105_s12  ;;  %258 = vmatpush1.bf16.msra.mxu0 %v1052_v11 }
  0x10   :  { %90 = vrot.lane.b32.xlu1 %v958_v16, %s1105_s12  ;;  %v952_v27 = vpack.c.bf16 %v45_v24, %v45_v24  ;;  %v954_v28 = vpack.c.bf16 %v47_v25, %v47_v25  ;;  %v953_v29 = vpack.c.bf16 %v46_v26, %v46_v26  ;;  %v48_v30 = vld [vmem:[#allocation2 + $0x20] sm:$0xff]  ;;  %259 = vmatprep.subr.bf16.mxu0 %v1103_v2  ;;  %v1071_v34 = vld [vmem:[%s1393_s4 + $0x68] sm:$0xff]  }
  0x11   :  { %125 = vst.msk [vmem:[#allocation4 + $0x14] sm:$0xf] %vm65_vm2, %v962_v22  ;;  %126 = vst.msk [vmem:[#allocation4 + $0x1c] sm:$0xf] %vm65_vm2, %v963_v23  ;;  %v955_v31 = vpack.c.bf16 %v48_v30, %v48_v30  ;;  %v103_v33 = vld [vmem:[#allocation2 + $0x2] sm:$0xff]  ;;  %v1067_v30 = vld [vmem:[%s1393_s4 + $0x78] sm:$0xff]  }
  0x12   :  { %66 = vst.msk [vmem:[#allocation4] sm:$0xf] %vm65_vm2, %v952_v27  ;;  %68 = vst.msk [vmem:[#allocation4 + $0x10] sm:$0xf] %vm65_vm2, %v954_v28  ;;  %v960_v35 = vpack.c.bf16 %v103_v33, %v103_v33  ;;  %985 = vmatprep.subr.bf16.mxu1 %v1067_v30  ;;  %v1070_v33 = vld [vmem:[%s1393_s4 + $0x30] sm:$0xff]  }
  0x13   :  { %67 = vst.msk [vmem:[#allocation4 + $0x8] sm:$0xf] %vm65_vm2, %v953_v29  ;;  %69 = vst.msk [vmem:[#allocation4 + $0x18] sm:$0xf] %vm65_vm2, %v955_v31  ;;  %88 = vrot.lane.b32.xlu0 %v957_v20, %s1105_s12  ;;  %260 = vmatpush1.bf16.msra.mxu0 %v1053_v32  ;;  %v1068_v31 = vld [vmem:[%s1393_s4 + $0x38] sm:$0xff]   ;;  %v1069_v32 = vld [vmem:[%s1393_s4 + $0x70] sm:$0xff]  }
  0x14   :  { %92 = vrot.lane.b32.xlu1 %v959_v21, %s1105_s12  ;;  %123 = vst.msk [vmem:[#allocation4 + $0x4] sm:$0xf] %vm65_vm2, %v960_v35  ;;  %124 = vst.msk [vmem:[#allocation4 + $0xc] sm:$0xf] %vm65_vm2, %v961_v36  ;;  %261 = vmatprep.subr.bf16.mxu0 %v1103_v2  ;;  %v1072_v35 = vld [vmem:[%s1393_s4 + $0x28] sm:$0xff]   ;;  %v1073_v36 = vld [vmem:[%s1393_s4 + $0x60] sm:$0xff]  }
  0x15   :  { %986 = vmatpush3.bf16.msra.mxu1 %v1068_v31 }
  0x16   :  { %987 = vmatprep.subr.bf16.mxu1 %v1069_v32 }
  0x17   :  { %262 = vmatpush1.bf16.msra.mxu0 %v1054_v37  ;;  %v1074_v37 = vld [vmem:[%s1393_s4 + $0x20] sm:$0xff]  }
  0x18   :  { %263 = vmatprep.subr.bf16.mxu0 %v1103_v2  ;;  %v1064_v50 = vld [vmem:[#allocation4 + $0x14] ss:$8 sps:$4 sm:$0xff]  }
  0x19   :  { %988 = vmatpush3.bf16.msra.mxu1 %v1070_v33 }
  0x1a   :  { %989 = vmatprep.subr.bf16.mxu1 %v1071_v34 }
  0x1b   :  { %264 = vmatpush1.bf16.msra.mxu0 %v1055_v38  ;;  %v1063_v49 = vld [vmem:[#allocation4 + $0x4] ss:$8 sps:$4 sm:$0xff]   ;;  %v1075_v38 = vld [vmem:[%s1393_s4 + $0x58] sm:$0xff]  }
  0x1c   :  { %265 = vmatprep.subr.bf16.mxu0 %v1103_v2  ;;  %908 = vmatprep.mubr.msk.bf16.mxu0 %vm35_vm1, %v1063_v49 }
  0x1d   :  { %990 = vmatpush3.bf16.msra.mxu1 %v1072_v35 }
  0x1e   :  { %991 = vmatprep.subr.bf16.mxu1 %v1073_v36 }
  0x1f   :  { %266 = vmatpush1.bf16.msra.mxu0 %v1056_v39  ;;  %v1076_v39 = vld [vmem:[%s1393_s4 + $0x18] sm:$0xff]  }
  0x20   :  { %275 = vmatprep.subr.bf16.mxu0 %v1103_v2 }
  0x21   :  { %992 = vmatpush3.bf16.msra.mxu1 %v1074_v37  ;;  %v1089_v37 = vld [vmem:[%s1393_s4 + $0xb0] sm:$0xff]  }
  0x22   :  { %993 = vmatprep.subr.bf16.mxu1 %v1075_v38 }
  0x23   :  { %276 = vmatpush2.bf16.msra.mxu0 %v1057_v40  ;;  %v1077_v40 = vld [vmem:[%s1393_s4 + $0x50] sm:$0xff]  }
  0x24   :  { %277 = vmatprep.subr.bf16.mxu0 %v1103_v2 }
  0x25   :  { %994 = vmatpush3.bf16.msra.mxu1 %v1076_v39  ;;  %v1090_v39 = vld [vmem:[%s1393_s4 + $0xa8] sm:$0xff]  }
  0x26   :  { %995 = vmatprep.subr.bf16.mxu1 %v1077_v40 }
  0x27   :  { %278 = vmatpush2.bf16.msra.mxu0 %v1058_v41  ;;  %v1078_v41 = vld [vmem:[%s1393_s4 + $0x10] sm:$0xff]  }
  0x28   :  { %279 = vmatprep.subr.bf16.mxu0 %v1103_v2 }
  0x29   :  { %996 = vmatpush3.bf16.msra.mxu1 %v1078_v41  ;;  %v1093_v41 = vld [vmem:[%s1393_s4 + $0xa0] sm:$0xff]  }
  0x2b   :  { %280 = vmatpush2.bf16.msra.mxu0 %v1059_v42  ;;  %v1079_v42 = vld [vmem:[%s1393_s4 + $0x48] sm:$0xff]  }
  0x2c   :  { %281 = vmatprep.subr.bf16.mxu0 %v1103_v2  ;;  %997 = vmatprep.subr.bf16.mxu1 %v1079_v42 }
  0x2f   :  { %282 = vmatpush2.bf16.msra.mxu0 %v1060_v43  ;;  %v1080_v43 = vld [vmem:[%s1393_s4 + $0x8] sm:$0xff]  }
  0x30   :  { %998 = vmatpush3.bf16.msra.mxu1 %v1080_v43  ;;  %v1094_v43 = vld [vmem:[%s1393_s4 + $0x98] sm:$0xff]  }
  0x81   :  { %v87_v44 = vpop.permute.xlu0 %86 }
  0x82   :  { %v91_v45 = vpop.permute.xlu1 %90  ;;  %99 = vst.msk [vmem:[#allocation4] sm:$0xf] %vm98_vm3, %v87_v44  ;;  %v1081_v44 = vld [vmem:[%s1393_s4 + $0x40] sm:$0xff]  }
  0x83   :  { %101 = vst.msk [vmem:[#allocation4 + $0x10] sm:$0xf] %vm98_vm3, %v91_v45  ;;  %v1082_v45 = vld [vmem:[%s1393_s4] sm:$0xff]   ;;  %999 = vmatprep.subr.bf16.mxu1 %v1081_v44  ;;  %v1095_v44 = vld [vmem:[%s1393_s4 + $0x90] sm:$0xff]  }
  0x84   :  { %1000 = vmatpush3.bf16.msra.mxu1 %v1082_v45  ;;  %v1096_v45 = vld [vmem:[%s1393_s4 + $0x88] sm:$0xff]  }
  0x85   :  { %v89_v46 = vpop.permute.xlu0 %88 }
  0x86   :  { %v93_v47 = vpop.permute.xlu1 %92  ;;  %100 = vst.msk [vmem:[#allocation4 + $0x8] sm:$0xf] %vm98_vm3, %v89_v46  ;;  %v1300_v46 = vld [vmem:[%s1393_s4 + $0xb8] sm:$0xff]  }
  0x87   :  { %102 = vst.msk [vmem:[#allocation4 + $0x18] sm:$0xf] %vm98_vm3, %v93_v47  ;;  %1023 = vmatprep.subr.bf16.mxu1 %v1300_v46 }
  0x8d   :  { %v1061_v48 = vld [vmem:[#allocation4] ss:$8 sps:$4 sm:$0xff]  }
  0x8e   :  { %284 = vmatmul.mubr.bf16.vlgmr.msra.gmra.mxu0 %v1061_v48  ;;  %v1066_v51 = vld [vmem:[#allocation4 + $0x10] ss:$8 sps:$4 sm:$0xff]  }
  0x8f   :  { %909 = vmatprep.mubr.msk.bf16.mxu0 %vm35_vm1, %v1064_v50 }
  0x96   :  { %292 = vmatmul.mubr.bf16.gmra.mxu0 %v1066_v51 }
 0x14e   :  { %v1221_v52 = vpop.f32.mrf.mxu0 }
 0x14f   :  { %v309_v58 = vmul.f32 %v1221_v52, %v1221_v52 }
 0x150   :  { %v287_v53 = vpop.f32.mrf.mxu0 }
 0x152   :  { %v1223_v54 = vpop.f32.mrf.mxu0 }
 0x153   :  { %v310_v56 = vmul.f32 %v1223_v54, %v1223_v54  ;;  %v300_v59 = vadd.f32 %v1223_v54, %v1221_v52 }
 0x154   :  { %v290_v55 = vpop.f32.mrf.mxu0 }
 0x155   :  { %v313_v62 = vadd.f32 %v310_v56, %v309_v58 }
 0x156   :  { %v1227_v57 = vpop.f32.mrf.mxu0 }
 0x157   :  { %v311_v60 = vmul.f32 %v1227_v57, %v1227_v57  ;;  %v301_v63 = vadd.f32 %v300_v59, %v1227_v57  ;;  %v358_v59 = vlaneseq }
 0x158   :  { %v295_v61 = vpop.f32.mrf.mxu0 }
 0x159   :  { %v314_v1 = vadd.f32 %v313_v62, %v311_v60  ;;  %v359_v60 = vshrl.u32 %v358_v59, 7  ;;  %v350_v61 = vld [vmem:[%s1394_s2] sm:$0x1] }
 0x15a   :  { %v1236_v0 = vpop.f32.mrf.mxu0 }
 0x15b   :  { %v302_v2 = vadd.f32 %v301_v63, %v1236_v0  ;;  %v312_v3 = vmul.f32 %v1236_v0, %v1236_v0  ;;  %v1306_v62 = vsub.s32 0, %v359_v60 }
 0x15c   :  { %v298_v4 = vpop.f32.mrf.mxu0 }
 0x15d   :  { %v303_v5 = vrot.slane %v302_v2, 4  ;;  %v315_v6 = vadd.f32 %v314_v1, %v312_v3 }
 0x15f   :  { %v304_v7 = vadd.f32 %v303_v5, %v302_v2  ;;  %v316_v8 = vrot.slane %v315_v6, 4  ;;  %v354_v2 = vld [vmem:[%s1395_s3] sm:$0x1] }
 0x161   :  { %v305_v9 = vrot.slane %v304_v7, 2  ;;  %v317_v10 = vadd.f32 %v316_v8, %v315_v6 }
 0x163   :  { %v306_v11 = vadd.f32 %v305_v9, %v304_v7  ;;  %v318_v12 = vrot.slane %v317_v10, 2 }
 0x165   :  { %v307_v13 = vrot.slane %v306_v11, 1  ;;  %v319_v14 = vadd.f32 %v318_v12, %v317_v10 }
 0x167   :  { %v308_v15 = vadd.f32 %v307_v13, %v306_v11  ;;  %v320_v16 = vrot.slane %v319_v14, 1 }
 0x169   :  { %322 = vrot.lane.b32.xlu0 %v308_v15, %s1106_s1  ;;  %v321_v17 = vadd.f32 %v320_v16, %v319_v14 }
 0x16b   :  { %335 = vrot.lane.b32.xlu1 %v321_v17, %s1106_s1 }
 0x1db   :  { %v323_v18 = vpop.permute.xlu0 %322 }
 0x1dc   :  { %v324_v19 = vadd.f32 %v323_v18, %v308_v15 }
 0x1dd   :  { %v336_v20 = vpop.permute.xlu1 %335 }
 0x1de   :  { %v337_v21 = vadd.f32 %v336_v20, %v321_v17  ;;  %325 = vrot.lane.b32.xlu0 %v324_v19, %s1107_s29 }
 0x1e0   :  { %338 = vrot.lane.b32.xlu1 %v337_v21, %s1107_s29 }
 0x250   :  { %v326_v22 = vpop.permute.xlu0 %325 }
 0x251   :  { %v327_v23 = vadd.f32 %v326_v22, %v324_v19 }
 0x252   :  { %v339_v24 = vpop.permute.xlu1 %338 }
 0x253   :  { %v340_v25 = vadd.f32 %v339_v24, %v337_v21  ;;  %328 = vrot.lane.b32.xlu0 %v327_v23, %s1108_s0 }
 0x255   :  { %341 = vrot.lane.b32.xlu1 %v340_v25, %s1108_s0 }
 0x2c5   :  { %v329_v26 = vpop.permute.xlu0 %328 }
 0x2c6   :  { %v330_v27 = vadd.f32 %v329_v26, %v327_v23 }
 0x2c7   :  { %v342_v28 = vpop.permute.xlu1 %341 }
 0x2c8   :  { %v343_v29 = vadd.f32 %v342_v28, %v340_v25  ;;  %331 = vrot.lane.b32.xlu0 %v330_v27, %s1105_s12 }
 0x2ca   :  { %344 = vrot.lane.b32.xlu1 %v343_v29, %s1105_s12 }
 0x33a   :  { %v332_v47 = vpop.permute.xlu0 %331 }
 0x33b   :  { %v333_v48 = vadd.f32 %v332_v47, %v330_v27 }
 0x33c   :  { %v345_v49 = vpop.permute.xlu1 %344 }
 0x33d   :  { %v334_v50 = vmul.f32 0.001953125, %v333_v48  ;;  %v346_v51 = vadd.f32 %v345_v49, %v343_v29 }
 0x33f   :  { %v348_v53 = vmul.f32 %v334_v50, %v334_v50  ;;  %v347_v55 = vmul.f32 0.001953125, %v346_v51 }
 0x341   :  { %v349_v56 = vsub.f32 %v347_v55, %v348_v53 }
 0x343   :  { %v351_v58 = vadd.f32 1e-05, %v349_v56 }
 0x345   :  { %1099 = vrsqrt.f32 %v351_v58 }
 0x352   :  { %v1100_v63 = vpop.eup %1099 }
 0x353   :  { %v353_v1 = vmul.f32 %v1100_v63, %v350_v61 }
 0x355   :  { %v355_v3 = vmul.f32 %v353_v1, %v334_v50  ;;  %v361_v4 = vrot.slane %v353_v1, %v1306_v62 }
 0x357   :  { %v356_v5 = vsub.f32 %v354_v2, %v355_v3  ;;  %v363_v6 = vmul.f32 %v361_v4, %v1221_v52  ;;  %v364_v7 = vmul.f32 %v361_v4, %v1223_v54  ;;  %v365_v8 = vmul.f32 %v361_v4, %v1227_v57 }
 0x358   :  { %v366_v9 = vmul.f32 %v361_v4, %v1236_v0 }
 0x359   :  { %v371_v10 = vrot.slane %v356_v5, %v1306_v62 }
 0x35b   :  { %v373_v11 = vadd.f32 %v371_v10, %v363_v6  ;;  %v374_v12 = vadd.f32 %v371_v10, %v364_v7  ;;  %v375_v13 = vadd.f32 %v371_v10, %v365_v8  ;;  %v376_v14 = vadd.f32 %v371_v10, %v366_v9 }
 0x35d   :  { %v377_v15 = vmax.f32 %v373_v11, 0.0  ;;  %v378_v16 = vmax.f32 %v374_v12, 0.0  ;;  %v379_v17 = vmax.f32 %v375_v13, 0.0  ;;  %v380_v18 = vmax.f32 %v376_v14, 0.0 }
 0x35f   :  { %381 = vst [vmem:[#allocation3 + $0x1] sm:$0xff] %v377_v15  ;;  %382 = vst [vmem:[#allocation3 + $0x9] sm:$0xff] %v378_v16  ;;  %v968_v52 = vpack.c.bf16 %v377_v15, %v377_v15  ;;  %v969_v54 = vpack.c.bf16 %v378_v16, %v378_v16  ;;  %v970_v19 = vpack.c.bf16 %v379_v17, %v379_v17 }
 0x360   :  { %383 = vst [vmem:[#allocation3 + $0x19] sm:$0xff] %v379_v17  ;;  %384 = vst [vmem:[#allocation3 + $0x21] sm:$0xff] %v380_v18  ;;  %v971_v57 = vpack.c.bf16 %v380_v18, %v380_v18 }
 0x361   :  { %433 = vst [vmem:[#allocation5 + $0x4] sm:$0xf] %v968_v52  ;;  %434 = vst [vmem:[#allocation5 + $0x10] sm:$0xf] %v969_v54 }
 0x362   :  { %435 = vst [vmem:[#allocation5 + $0x1c] sm:$0xf] %v970_v19  ;;  %436 = vst [vmem:[#allocation5 + $0x28] sm:$0xf] %v971_v57 }
 0x366   :  { %v389_v0 = vld [vmem:[#allocation3] sm:$0xff]  ;;  %v390_v20 = vld [vmem:[#allocation3 + $0x8] sm:$0xff] }
 0x367   :  { %v391_v21 = vld [vmem:[#allocation3 + $0x18] sm:$0xff]  ;;  %v964_v22 = vpack.c.bf16 %v389_v0, %v389_v0  ;;  %v965_v23 = vpack.c.bf16 %v390_v20, %v390_v20  ;;  %v392_v24 = vld [vmem:[#allocation3 + $0x20] sm:$0xff]  ;;  %v438_v27 = vld [vmem:[#allocation3 + $0xa] sm:$0xff] }
 0x368   :  { %v966_v25 = vpack.c.bf16 %v391_v21, %v391_v21  ;;  %v437_v26 = vld [vmem:[#allocation3 + $0x2] sm:$0xff]  ;;  %v967_v28 = vpack.c.bf16 %v392_v24, %v392_v24  ;;  %v973_v30 = vpack.c.bf16 %v438_v27, %v438_v27  ;;  %v439_v31 = vld [vmem:[#allocation3 + $0x1a] sm:$0xff] }
 0x369   :  { %v972_v29 = vpack.c.bf16 %v437_v26, %v437_v26  ;;  %v440_v32 = vld [vmem:[#allocation3 + $0x22] sm:$0xff]  ;;  %409 = vst [vmem:[#allocation5] sm:$0xf] %v964_v22  ;;  %410 = vst [vmem:[#allocation5 + $0xc] sm:$0xf] %v965_v23  ;;  %v974_v33 = vpack.c.bf16 %v439_v31, %v439_v31 }
 0x36a   :  { %411 = vst [vmem:[#allocation5 + $0x18] sm:$0xf] %v966_v25  ;;  %v975_v34 = vpack.c.bf16 %v440_v32, %v440_v32  ;;  %412 = vst [vmem:[#allocation5 + $0x24] sm:$0xf] %v967_v28  ;;  %v1085_v36 = vld [vmem:[#allocation5 + $0x4] ss:$12 sps:$4 sm:$0xff]  }
 0x36b   :  { %457 = vst [vmem:[#allocation5 + $0x8] sm:$0xf] %v972_v29  ;;  %458 = vst [vmem:[#allocation5 + $0x14] sm:$0xf] %v973_v30  ;;  %725 = vmatprep.mubr.bf16.mxu1 %v1085_v36  ;;  %v1087_v38 = vld [vmem:[#allocation5 + $0x1c] ss:$12 sps:$4 sm:$0xff]  }
 0x36c   :  { %459 = vst [vmem:[#allocation5 + $0x20] sm:$0xf] %v974_v33  ;;  %460 = vst [vmem:[#allocation5 + $0x2c] sm:$0xf] %v975_v34 }
 0x370   :  { %v1083_v35 = vld [vmem:[#allocation5] ss:$12 sps:$4 sm:$0xff]  }
 0x371   :  { %726 = vmatmul.mubr.bf16.vlgmr.msra.gmra.mxu1 %v1083_v35  ;;  %v1091_v40 = vld [vmem:[#allocation5 + $0x18] ss:$12 sps:$4 sm:$0xff]  }
 0x372   :  { %1024 = vmatpush3.bf16.msra.mxu1 %v1300_v46  ;;  %733 = vmatprep.mubr.bf16.mxu1 %v1087_v38  ;;  %v1092_v42 = vld [vmem:[#allocation5 + $0x8] ss:$12 sps:$4 sm:$0xff]   ;;  %v1097_v46 = vld [vmem:[%s1393_s4 + $0x80] sm:$0xff]  }
 0x373   :  { %1025 = vmatprep.subr.bf16.mxu1 %v1089_v37  ;;  %v1098_v47 = vld [vmem:[#allocation5 + $0x20] ss:$12 sps:$4 sm:$0xff]  }
 0x376   :  { %1026 = vmatpush3.bf16.msra.mxu1 %v1089_v37 }
 0x377   :  { %1027 = vmatprep.subr.bf16.mxu1 %v1090_v39 }
 0x379   :  { %734 = vmatmul.mubr.bf16.gmra.mxu1 %v1091_v40 }
 0x37a   :  { %1028 = vmatpush3.bf16.msra.mxu1 %v1090_v39  ;;  %1039 = vmatprep.mubr.bf16.mxu1 %v1092_v42 }
 0x37b   :  { %1029 = vmatprep.subr.bf16.mxu1 %v1093_v41 }
 0x37e   :  { %1030 = vmatpush3.bf16.msra.mxu1 %v1093_v41 }
 0x37f   :  { %1031 = vmatprep.subr.bf16.mxu1 %v1094_v43 }
 0x382   :  { %1032 = vmatpush3.bf16.msra.mxu1 %v1094_v43 }
 0x383   :  { %1033 = vmatprep.subr.bf16.mxu1 %v1095_v44 }
 0x386   :  { %1034 = vmatpush3.bf16.msra.mxu1 %v1095_v44 }
 0x387   :  { %1035 = vmatprep.subr.bf16.mxu1 %v1096_v45 }
 0x38a   :  { %1036 = vmatpush3.bf16.msra.mxu1 %v1096_v45 }
 0x38b   :  { %1037 = vmatprep.subr.bf16.mxu1 %v1097_v46 }
 0x38e   :  { %1038 = vmatpush3.bf16.msra.mxu1 %v1097_v46 }
 0x391   :  { %1040 = vmatmul.mubr.bf16.vlgmr.msra.gmra.mxu1 %v1098_v47 }
 0x431   :  { %v1001_v48 = vpop.f32.mrf.mxu1 }
 0x433   :  { %v1002_v49 = vpop.f32.mrf.mxu1 }
 0x434   :  { %v1003_v61 = vadd.f32 %v1002_v49, %v1001_v48  ;;  %v841_v48 = vld [vmem:[%s1396_s5] sm:$0x1] }
 0x435   :  { %v1004_v50 = vpop.f32.mrf.mxu1 }
 0x437   :  { %v1005_v51 = vpop.f32.mrf.mxu1 }
 0x438   :  { %v1006_v1 = vadd.f32 %v1005_v51, %v1004_v50  ;;  %v845_v51 = vld [vmem:[%s1397_s6] sm:$0x1] }
 0x439   :  { %v1007_v53 = vpop.f32.mrf.mxu1 }
 0x43b   :  { %v1008_v55 = vpop.f32.mrf.mxu1 }
 0x43c   :  { %v1009_v2 = vadd.f32 %v1008_v55, %v1007_v53 }
 0x43d   :  { %v1010_v56 = vpop.f32.mrf.mxu1 }
 0x43f   :  { %v1011_v58 = vpop.f32.mrf.mxu1 }
 0x440   :  { %v1012_v5 = vadd.f32 %v1011_v58, %v1010_v56 }
 0x451   :  { %v1041_v59 = vpop.f32.mrf.mxu1 }
 0x452   :  { %v1341_v6 = vadd.f32 %v1041_v59, %v1009_v2 }
 0x453   :  { %v776_v60 = vpop.f32.mrf.mxu1 }
 0x454   :  { %v1339_v3 = vadd.f32 %v1003_v61, %v776_v60  ;;  %v802_v12 = vmul.f32 %v1341_v6, %v1341_v6 }
 0x455   :  { %v1042_v63 = vpop.f32.mrf.mxu1 }
 0x456   :  { %v800_v8 = vmul.f32 %v1339_v3, %v1339_v3  ;;  %v1347_v9 = vadd.f32 %v1042_v63, %v1012_v5 }
 0x457   :  { %v779_v4 = vpop.f32.mrf.mxu1 }
 0x458   :  { %v1343_v7 = vadd.f32 %v1006_v1, %v779_v4  ;;  %v803_v15 = vmul.f32 %v1347_v9, %v1347_v9 }
 0x45a   :  { %v791_v10 = vadd.f32 %v1343_v7, %v1339_v3  ;;  %v801_v11 = vmul.f32 %v1343_v7, %v1343_v7 }
 0x45c   :  { %v792_v13 = vadd.f32 %v791_v10, %v1341_v6  ;;  %v804_v14 = vadd.f32 %v801_v11, %v800_v8 }
 0x45e   :  { %v793_v16 = vadd.f32 %v792_v13, %v1347_v9  ;;  %v805_v17 = vadd.f32 %v804_v14, %v802_v12 }
 0x460   :  { %v794_v18 = vrot.slane %v793_v16, 4  ;;  %v806_v52 = vadd.f32 %v805_v17, %v803_v15 }
 0x462   :  { %v795_v54 = vadd.f32 %v794_v18, %v793_v16  ;;  %v807_v19 = vrot.slane %v806_v52, 4 }
 0x464   :  { %v796_v57 = vrot.slane %v795_v54, 2  ;;  %v808_v0 = vadd.f32 %v807_v19, %v806_v52 }
 0x466   :  { %v797_v20 = vadd.f32 %v796_v57, %v795_v54  ;;  %v809_v21 = vrot.slane %v808_v0, 2 }
 0x468   :  { %v798_v22 = vrot.slane %v797_v20, 1  ;;  %v810_v23 = vadd.f32 %v809_v21, %v808_v0 }
 0x46a   :  { %v799_v24 = vadd.f32 %v798_v22, %v797_v20  ;;  %v811_v25 = vrot.slane %v810_v23, 1 }
 0x46c   :  { %813 = vrot.lane.b32.xlu0 %v799_v24, %s1106_s1  ;;  %v812_v26 = vadd.f32 %v811_v25, %v810_v23 }
 0x46e   :  { %826 = vrot.lane.b32.xlu1 %v812_v26, %s1106_s1 }
 0x4de   :  { %v814_v27 = vpop.permute.xlu0 %813 }
 0x4df   :  { %v815_v28 = vadd.f32 %v814_v27, %v799_v24 }
 0x4e0   :  { %v827_v29 = vpop.permute.xlu1 %826 }
 0x4e1   :  { %v828_v30 = vadd.f32 %v827_v29, %v812_v26  ;;  %816 = vrot.lane.b32.xlu0 %v815_v28, %s1107_s29 }
 0x4e3   :  { %829 = vrot.lane.b32.xlu1 %v828_v30, %s1107_s29 }
 0x553   :  { %v817_v31 = vpop.permute.xlu0 %816 }
 0x554   :  { %v818_v32 = vadd.f32 %v817_v31, %v815_v28 }
 0x555   :  { %v830_v33 = vpop.permute.xlu1 %829 }
 0x556   :  { %v831_v34 = vadd.f32 %v830_v33, %v828_v30  ;;  %819 = vrot.lane.b32.xlu0 %v818_v32, %s1108_s0 }
 0x558   :  { %832 = vrot.lane.b32.xlu1 %v831_v34, %s1108_s0 }
 0x5c8   :  { %v820_v35 = vpop.permute.xlu0 %819 }
 0x5c9   :  { %v821_v36 = vadd.f32 %v820_v35, %v818_v32 }
 0x5ca   :  { %v833_v37 = vpop.permute.xlu1 %832 }
 0x5cb   :  { %v834_v38 = vadd.f32 %v833_v37, %v831_v34  ;;  %822 = vrot.lane.b32.xlu0 %v821_v36, %s1105_s12 }
 0x5cd   :  { %835 = vrot.lane.b32.xlu1 %v834_v38, %s1105_s12 }
 0x63d   :  { %v823_v39 = vpop.permute.xlu0 %822 }
 0x63e   :  { %v824_v40 = vadd.f32 %v823_v39, %v821_v36 }
 0x63f   :  { %v836_v41 = vpop.permute.xlu1 %835 }
 0x640   :  { %v825_v42 = vmul.f32 0.001953125, %v824_v40  ;;  %v837_v43 = vadd.f32 %v836_v41, %v834_v38 }
 0x642   :  { %v839_v44 = vmul.f32 %v825_v42, %v825_v42  ;;  %v838_v45 = vmul.f32 0.001953125, %v837_v43 }
 0x644   :  { %v840_v46 = vsub.f32 %v838_v45, %v839_v44 }
 0x646   :  { %v842_v47 = vadd.f32 1e-05, %v840_v46 }
 0x648   :  { %1101 = vrsqrt.f32 %v842_v47 }
 0x655   :  { %v1102_v49 = vpop.eup %1101 }
 0x656   :  { %v844_v50 = vmul.f32 %v1102_v49, %v841_v48 }
 0x658   :  { %v846_v53 = vmul.f32 %v844_v50, %v825_v42  ;;  %v852_v55 = vrot.slane %v844_v50, %v1306_v62 }
 0x65a   :  { %v847_v56 = vsub.f32 %v845_v51, %v846_v53  ;;  %v854_v58 = vmul.f32 %v852_v55, %v1339_v3  ;;  %v855_v59 = vmul.f32 %v852_v55, %v1343_v7  ;;  %v856_v60 = vmul.f32 %v852_v55, %v1341_v6 }
 0x65b   :  { %v857_v61 = vmul.f32 %v852_v55, %v1347_v9 }
 0x65c   :  { %v862_v63 = vrot.slane %v847_v56, %v1306_v62 }
 0x65e   :  { %v864_v1 = vadd.f32 %v862_v63, %v854_v58  ;;  %v865_v2 = vadd.f32 %v862_v63, %v855_v59  ;;  %v866_v4 = vadd.f32 %v862_v63, %v856_v60  ;;  %v867_v5 = vadd.f32 %v862_v63, %v857_v61 }
 0x660   :  { %v868_v8 = vmax.f32 %v864_v1, 0.0  ;;  %v869_v10 = vmax.f32 %v865_v2, 0.0  ;;  %v870_v11 = vmax.f32 %v866_v4, 0.0  ;;  %v871_v12 = vmax.f32 %v867_v5, 0.0 }
 0x662   :  { %872 = vst [vmem:[%s1398_s7] sm:$0xff] %v868_v8  ;;  %873 = vst [vmem:[%s1398_s7 + $0x8] sm:$0xff] %v869_v10 }
 0x663   :  { %874 = vst [vmem:[%s1398_s7 + $0x10] sm:$0xff] %v870_v11  ;;  %875 = vst [vmem:[%s1398_s7 + $0x18] sm:$0xff] %v871_v12 }

</bundles_post_ra>
